<compile_context>
chip_gen: v7x
topology: tpu7x:2x2x1
jax: 0.10.0
libtpu: 0.0.40
codegen_flags: <defaults>
</compile_context>

<pallas_src>
import functools

import jax
import jax.numpy as jnp
from jax import lax
from jax.experimental import pallas as pl
from jax.experimental.pallas import tpu as pltpu


def _round_up(a, b):
    return (a + b - 1) // b * b


# --------------------------- pass 1: channel pooling ---------------------------
def _pool_kernel(x_ref, o_ref, *, C, t_c, HW):
    c = pl.program_id(1)
    n_blocks = pl.num_programs(1)

    @pl.when(c == 0)
    def _():
        o_ref[0, 0:1] = jnp.zeros((1, HW), jnp.float32)
        o_ref[0, 1:2] = jnp.full((1, HW), -jnp.inf, jnp.float32)

    x = x_ref[0].astype(jnp.float32)                       # (t_c, HW) lane-dense

    def _accumulate(x_sum, x_max):
        o_ref[0, 0:1] += jnp.sum(x_sum, axis=0, keepdims=True)
        o_ref[0, 1:2] = jnp.maximum(o_ref[0, 1:2],
                                    jnp.max(x_max, axis=0, keepdims=True))

    rem = C % t_c
    if rem == 0:
        # no channel remainder anywhere: pure unmasked streaming reduce
        _accumulate(x, x)
    else:
        @pl.when(c < n_blocks - 1)
        def _():
            _accumulate(x, x)

        @pl.when(c == n_blocks - 1)
        def _():
            # mask out-of-range channels of the final block (0 / -inf)
            valid = lax.broadcasted_iota(jnp.int32, (t_c, 1), 0) < rem
            _accumulate(jnp.where(valid, x, 0.0),
                        jnp.where(valid, x, -jnp.inf))

    @pl.when(c == n_blocks - 1)
    def _():
        o_ref[0, 0:1] = o_ref[0, 0:1] * jnp.float32(1.0 / C)   # sum -> mean


# ----------------------- pass 2: 2->1 KxK conv + sigmoid -----------------------
def _conv_sigmoid_kernel(w_ref, s_ref, o_ref, pad_ref, *, H, W, K, pad):
    # zero-padded (2, H+2p, W+2p) map: channel 0 = mean, channel 1 = max
    pad_ref[...] = jnp.zeros_like(pad_ref)
    pad_ref[0, pad:pad + H, pad:pad + W] = s_ref[0, 0]
    pad_ref[1, pad:pad + H, pad:pad + W] = s_ref[0, 1]

    acc = jnp.zeros((H, W), jnp.float32)
    for ci in range(2):                                    # static unroll: 2*K*K taps
        for ky in range(K):
            for kx in range(K):
                wgt = w_ref[(ci * K + ky) * K + kx]        # scalar tap from SMEM
                acc = acc + wgt * pad_ref[ci, ky:ky + H, kx:kx + W]
    o_ref[0, 0] = jax.nn.sigmoid(acc).astype(o_ref.dtype)


# ----------------------------------- wrapper -----------------------------------
def spatial_attention(x, conv_w, *, block_bytes=8 * 1024 * 1024):
    """x: (B, C, H, W); conv_w: (1, 2, K, K) = Conv2d(2, 1, K, bias=False).weight.

    Returns sigmoid(conv2d(cat([mean_c(x), max_c(x)], 1), conv_w)) of shape
    (B, 1, H, W), matching PyTorch SpatialAttention.forward.
    """
    B, C, H, W = x.shape
    K = conv_w.shape[-1]
    pad = K // 2
    HW = H * W
    itemsize = x.dtype.itemsize

    # ---- channel-tile selection from PHYSICAL (sublane/lane padded) bytes ----
    sub = 8 * max(1, 4 // itemsize)           # sublane packing: f32 -> 8, bf16 -> 16
    hw_pad = _round_up(HW, 128)               # lane padding of the last dim
    bytes_per_ch = hw_pad * itemsize
    t_c = min(C, max(1, block_bytes // bytes_per_ch))
    if t_c < C:
        # partial channel blocks: keep them sublane-aligned
        t_c = min(C, max(sub, (t_c // sub) * sub))
    num_c_blocks = pl.cdiv(C, t_c)

    phys_in_block = _round_up(t_c, sub) * hw_pad * itemsize
    phys_out_block = 2 * hw_pad * 4
    vmem_limit = 2 * phys_in_block + 2 * phys_out_block + (4 << 20)
    vmem_limit = int(min(max(vmem_limit, 32 << 20), 64 << 20))

    # ---- pass 1: lane-dense streaming channel mean / max ---------------------
    x_flat = x.reshape(B, C, HW)
    pooled = pl.pallas_call(
        functools.partial(_pool_kernel, C=C, t_c=t_c, HW=HW),
        out_shape=jax.ShapeDtypeStruct((B, 2, HW), jnp.float32),
        grid=(B, num_c_blocks),
        in_specs=[pl.BlockSpec((1, t_c, HW), lambda b, c: (b, c, 0))],
        out_specs=pl.BlockSpec((1, 2, HW), lambda b, c: (b, 0, 0)),
        compiler_params=pltpu.CompilerParams(
            dimension_semantics=("parallel", "arbitrary"),
            vmem_limit_bytes=vmem_limit),
    )(x_flat)

    # ---- pass 2: tiny KxK conv over the pooled 2-channel map + sigmoid -------
    pooled = pooled.reshape(B, 2, H, W)
    w_flat = conv_w.reshape(-1).astype(jnp.float32)        # (2*K*K,) scalar taps
    out = pl.pallas_call(
        functools.partial(_conv_sigmoid_kernel, H=H, W=W, K=K, pad=pad),
        out_shape=jax.ShapeDtypeStruct((B, 1, H, W), x.dtype),
        grid=(B,),
        in_specs=[
            # conv taps: tiny, resident in SMEM for the whole kernel
            pl.BlockSpec(memory_space=pltpu.MemorySpace.SMEM),
            pl.BlockSpec((1, 2, H, W), lambda b: (b, 0, 0, 0)),
        ],
        out_specs=pl.BlockSpec((1, 1, H, W), lambda b: (b, 0, 0, 0)),
        scratch_shapes=[pltpu.VMEM((2, H + 2 * pad, W + 2 * pad), jnp.float32)],
        compiler_params=pltpu.CompilerParams(
            dimension_semantics=("parallel",)),
    )(w_flat, pooled)
    return out


# ---------------------------------- reference ----------------------------------
def _reference(x, conv_w):
    avg = jnp.mean(x, axis=1, keepdims=True)
    mx = jnp.max(x, axis=1, keepdims=True)
    s = jnp.concatenate([avg, mx], axis=1)                 # (B, 2, H, W)
    pad = conv_w.shape[-1] // 2
    y = lax.conv_general_dilated(
        s, conv_w, window_strides=(1, 1),
        padding=((pad, pad), (pad, pad)),
        dimension_numbers=("NCHW", "OIHW", "NCHW"),
        precision=lax.Precision.HIGHEST)
    return jax.nn.sigmoid(y)


if __name__ == "__main__":
    key = jax.random.PRNGKey(0)
    k_x, k_w, k_x2 = jax.random.split(key, 3)

    # main config matching the module defaults (kernel_size=7 -> padding=3)
    B, C, H, W, K = 2, 4, 16, 16, 7
    x = jax.random.normal(k_x, (B, C, H, W), dtype=jnp.float32)
    # Conv2d(2, 1, 7, padding=3, bias=False).weight has shape (1, 2, 7, 7)
    conv_w = jax.random.normal(k_w, (1, 2, K, K), dtype=jnp.float32) * 0.1

    out = jax.block_until_ready(spatial_attention(x, conv_w))
    ref = _reference(x, conv_w)
    assert out.shape == (B, 1, H, W)
    assert jnp.allclose(out, ref, atol=1e-4, rtol=1e-4), \
        float(jnp.max(jnp.abs(out - ref)))

    # second config: forces multiple channel blocks + a non-divisible remainder
    x2 = jax.random.normal(k_x2, (1, 11, 8, 24), dtype=jnp.float32)
    out2 = jax.block_until_ready(
        spatial_attention(x2, conv_w, block_bytes=8 * 1024))
    ref2 = _reference(x2, conv_w)
    assert out2.shape == (1, 1, 8, 24)
    assert jnp.allclose(out2, ref2, atol=1e-4, rtol=1e-4), \
        float(jnp.max(jnp.abs(out2 - ref2)))

    print("KERNEL_OK")
</pallas_src>

<mosaic_0001>
module attributes {stable_mosaic.version = 11 : i64} {
  func.func @_pool_kernel(%arg0: i32, %arg1: i32, %arg2: memref<1x4x256xf32, #tpu.memory_space<vmem>>, %arg3: memref<1x2x256xf32, #tpu.memory_space<vmem>>) attributes {dimension_semantics = [#tpu.dimension_semantics<parallel>, #tpu.dimension_semantics<arbitrary>], iteration_bounds = array<i64: 2, 1>, scalar_prefetch = 0 : i64, scratch_operands = 0 : i64, tpu.core_type = #tpu.core_type<tc>, window_params = [{transform_indices = @transform_0, window_bounds = array<i64: 1, 4, 256>}, {transform_indices = @transform_1, window_bounds = array<i64: 1, 2, 256>}]} {
    %c0_i32 = arith.constant 0 : i32
    %0 = arith.cmpi eq, %arg1, %c0_i32 : i32
    %1 = arith.extui %0 : i1 to i32
    %c0_i32_0 = arith.constant 0 : i32
    %2 = arith.cmpi ne, %1, %c0_i32_0 : i32
    scf.if %2 {
      %cst_17 = arith.constant 0.000000e+00 : f32
      %24 = vector.broadcast %cst_17 : f32 to vector<1x256xf32>
      %c0_18 = arith.constant 0 : index
      %c0_19 = arith.constant 0 : index
      %c0_20 = arith.constant 0 : index
      %25 = vector.load %arg3[%c0_18, %c0_19, %c0_20] : memref<1x2x256xf32, #tpu.memory_space<vmem>>, vector<1x1x256xf32>
      %26 = vector.shape_cast %25 : vector<1x1x256xf32> to vector<1x256xf32>
      %27 = vector.shape_cast %24 : vector<1x256xf32> to vector<1x1x256xf32>
      tpu.vector_store %arg3[%c0_18, %c0_19, %c0_20], %27 {strides = array<i32>} : memref<1x2x256xf32, #tpu.memory_space<vmem>>, vector<1x1x256xf32>,
      %cst_21 = arith.constant 0xFF800000 : f32
      %28 = vector.broadcast %cst_21 : f32 to vector<1x256xf32>
      %c0_22 = arith.constant 0 : index
      %c1_23 = arith.constant 1 : index
      %c0_24 = arith.constant 0 : index
      %29 = vector.load %arg3[%c0_22, %c1_23, %c0_24] : memref<1x2x256xf32, #tpu.memory_space<vmem>>, vector<1x1x256xf32>
      %30 = vector.shape_cast %29 : vector<1x1x256xf32> to vector<1x256xf32>
      %31 = vector.shape_cast %28 : vector<1x256xf32> to vector<1x1x256xf32>
      tpu.vector_store %arg3[%c0_22, %c1_23, %c0_24], %31 {strides = array<i32>} : memref<1x2x256xf32, #tpu.memory_space<vmem>>, vector<1x1x256xf32>,
    } else {
    }
    %c0 = arith.constant 0 : index
    %c0_1 = arith.constant 0 : index
    %c0_2 = arith.constant 0 : index
    %3 = vector.load %arg2[%c0, %c0_1, %c0_2] : memref<1x4x256xf32, #tpu.memory_space<vmem>>, vector<1x4x256xf32>
    %4 = vector.shape_cast %3 : vector<1x4x256xf32> to vector<4x256xf32>
    %c0_3 = arith.constant 0 : index
    %c0_4 = arith.constant 0 : index
    %c0_5 = arith.constant 0 : index
    %5 = vector.load %arg3[%c0_3, %c0_4, %c0_5] : memref<1x2x256xf32, #tpu.memory_space<vmem>>, vector<1x1x256xf32>
    %6 = vector.shape_cast %5 : vector<1x1x256xf32> to vector<1x256xf32>
    %cst = arith.constant dense<0.000000e+00> : vector<256xf32>
    %7 = vector.multi_reduction <add>, %4, %cst [0] : vector<4x256xf32> to vector<256xf32>
    %8 = vector.shape_cast %7 : vector<256xf32> to vector<1x256xf32>
    %9 = arith.addf %6, %8 : vector<1x256xf32>
    %c0_6 = arith.constant 0 : index
    %c0_7 = arith.constant 0 : index
    %c0_8 = arith.constant 0 : index
    %10 = vector.load %arg3[%c0_6, %c0_7, %c0_8] : memref<1x2x256xf32, #tpu.memory_space<vmem>>, vector<1x1x256xf32>
    %11 = vector.shape_cast %10 : vector<1x1x256xf32> to vector<1x256xf32>
    %12 = vector.shape_cast %9 : vector<1x256xf32> to vector<1x1x256xf32>
    tpu.vector_store %arg3[%c0_6, %c0_7, %c0_8], %12 {strides = array<i32>} : memref<1x2x256xf32, #tpu.memory_space<vmem>>, vector<1x1x256xf32>,
    %c0_9 = arith.constant 0 : index
    %c1 = arith.constant 1 : index
    %c0_10 = arith.constant 0 : index
    %13 = vector.load %arg3[%c0_9, %c1, %c0_10] : memref<1x2x256xf32, #tpu.memory_space<vmem>>, vector<1x1x256xf32>
    %14 = vector.shape_cast %13 : vector<1x1x256xf32> to vector<1x256xf32>
    %cst_11 = arith.constant dense<0xFF800000> : vector<256xf32>
    %15 = vector.multi_reduction <maximumf>, %4, %cst_11 [0] : vector<4x256xf32> to vector<256xf32>
    %16 = vector.shape_cast %15 : vector<256xf32> to vector<1x256xf32>
    %17 = arith.maximumf %14, %16 : vector<1x256xf32>
    %c0_12 = arith.constant 0 : index
    %c1_13 = arith.constant 1 : index
    %c0_14 = arith.constant 0 : index
    %18 = vector.load %arg3[%c0_12, %c1_13, %c0_14] : memref<1x2x256xf32, #tpu.memory_space<vmem>>, vector<1x1x256xf32>
    %19 = vector.shape_cast %18 : vector<1x1x256xf32> to vector<1x256xf32>
    %20 = vector.shape_cast %17 : vector<1x256xf32> to vector<1x1x256xf32>
    tpu.vector_store %arg3[%c0_12, %c1_13, %c0_14], %20 {strides = array<i32>} : memref<1x2x256xf32, #tpu.memory_space<vmem>>, vector<1x1x256xf32>,
    %c0_i32_15 = arith.constant 0 : i32
    %21 = arith.cmpi eq, %arg1, %c0_i32_15 : i32
    %22 = arith.extui %21 : i1 to i32
    %c0_i32_16 = arith.constant 0 : i32
    %23 = arith.cmpi ne, %22, %c0_i32_16 : i32
    scf.if %23 {
      %c0_17 = arith.constant 0 : index
      %c0_18 = arith.constant 0 : index
      %c0_19 = arith.constant 0 : index
      %24 = vector.load %arg3[%c0_17, %c0_18, %c0_19] : memref<1x2x256xf32, #tpu.memory_space<vmem>>, vector<1x1x256xf32>
      %25 = vector.shape_cast %24 : vector<1x1x256xf32> to vector<1x256xf32>
      %cst_20 = arith.constant 2.500000e-01 : f32
      %26 = vector.broadcast %cst_20 : f32 to vector<1x256xf32>
      %27 = arith.mulf %25, %26 : vector<1x256xf32>
      %c0_21 = arith.constant 0 : index
      %c0_22 = arith.constant 0 : index
      %c0_23 = arith.constant 0 : index
      %28 = vector.load %arg3[%c0_21, %c0_22, %c0_23] : memref<1x2x256xf32, #tpu.memory_space<vmem>>, vector<1x1x256xf32>
      %29 = vector.shape_cast %28 : vector<1x1x256xf32> to vector<1x256xf32>
      %30 = vector.shape_cast %27 : vector<1x256xf32> to vector<1x1x256xf32>
      tpu.vector_store %arg3[%c0_21, %c0_22, %c0_23], %30 {strides = array<i32>} : memref<1x2x256xf32, #tpu.memory_space<vmem>>, vector<1x1x256xf32>,
    } else {
    }
    return
  }
  func.func @transform_0(%arg0: i32, %arg1: i32) -> (i32, i32, i32) {
    %c0_i32 = arith.constant 0 : i32
    %c0_i32_0 = arith.constant 0 : i32
    return %arg0, %arg1, %c0_i32 : i32, i32, i32
  }
  func.func @transform_1(%arg0: i32, %arg1: i32) -> (i32, i32, i32) {
    %c0_i32 = arith.constant 0 : i32
    %c0_i32_0 = arith.constant 0 : i32
    %c0_i32_1 = arith.constant 0 : i32
    return %arg0, %c0_i32, %c0_i32_0 : i32, i32, i32
  }
}

</mosaic_0001>

<bundles_post_ra>
// kernel: tpu_custom_call.1
= control target key start
LH: loop header
LB: loop body
LE: loop exit
PB: predicated region body
PF: predicated region fallthrough
CT: control target
= control target key end

     0   :  { %6 = vsyncpa [#allocation3], 0  ;;  %s755_s0 = inlined_call_operand.hbm [shape: f32[2,4,256], index: 0, kind: input, shape index: {}]   ;;  %s756_s1 = inlined_call_operand.hbm [shape: f32[2,2,256], index: 1, kind: output, shape index: {}]  }
   0x1   :  { %8 = vsyncpa [#allocation3 + $0x1], 0 }
   0x2   :  { %9 = vsyncpa [#allocation4], 0 }
   0x3   :  { %11 = vsyncpa [#allocation4 + $0x1], 0  ;;  %s557_s6 = smov 0   ;;  %s559_s7 = smov 0  }
   0x4   :  { %s561_s8 = smov 0   ;;  %s563_s9 = smov 0  }
   0x5   :  { %s565_s10 = smov 0   ;;  %s567_s11 = smov 0  }
   0x6 LB: > { %s342_s12 = sadd.s32 4294967295, %s540_s11   ;;  %s343_s13 = sadd.s32 4294967294, %s540_s11   ;;  %s540_s11 = sphi %s567_s11, %s17_s11   ;;  %s536_s10 = sphi %s565_s10, %s774_s10   ;;  %s532_s9 = sphi %s563_s9, %s773_s9   ;;  %s528_s8 = sphi %s561_s8, %s772_s8   ;;  %s524_s7 = sphi %s559_s7, %s771_s7   ;;  %s520_s6 = sphi %s557_s6, %s770_s6  }
   0x7   : > { %s29_s14 = sadd.s32 1, %s536_s10  ;;  %s38_s15 = sadd.s32 1, %s528_s8 }
   0x8   : > { %p31_p0 = scmp.ge.s32.totalorder %s29_s14, 2  ;;  %p45_p1 = scmp.ne.s32.totalorder %s528_s8, %s524_s7 }
   0x9   : > { %p46_p2 = scmp.eq.s32.totalorder %s540_s11, 0  ;;  %p51_p3 = scmp.ne.s32.totalorder %s524_s7, %s520_s6 }
   0xa   : > { %s776_s14 = smov (%p31_p0, %s29_s14), 0  ;;  %p52_p5 = scmp.eq.s32.totalorder %s342_s12, 0 }
   0xb   : > { %p598_p4 = por %p46_p2, %p45_p1  ;;  %s33_s17 = ssub.s32 %s536_s10, %s776_s14 }
   0xc   : > { %p75_p6 = scmp.eq.s32.totalorder %s342_s12, 1  ;;  %p36_p7 = scmp.eq.s32.totalorder %s33_s17, 0 }
   0xd   : > { %p604_p8 = por %p52_p5, %p51_p3  ;;  %p81_p10 = scmp.eq.s32.totalorder %s343_s13, 1 }
   0xe   : > { %p608_p9 = por %p75_p6, %p45_p1  ;;  %p374_p13 = scmp.lt.s32.totalorder %s540_s11, 2 }
   0xf   : > { %s613_s20 = scalar_select %p36_p7, %s528_s8, %s38_s15  }
  0x10   : > { %s760_s19 = scalar_select %p608_p9, 1, 0 }
  0x11   : > { %p615_p11 = por %p81_p10, %p51_p3  ;;  %s101_s22 = sand.u32 1, %s528_s8  }
  0x12   : > { %s346_s23 = sshll.u32 %s101_s22, 3  ;;  %s360_s24 = sshll.u32 %s536_s10, 7 }
  0x13   : > { %s761_s21 = scalar_select %p615_p11, 1, 0 }
  0x14   : > { %s626_s27 = scalar_lea.hbm %s755_s0, %s360_s24  ;;  %s105_s28 = scalar_lea.vmem [#allocation2], %s346_s23 }
  0x15   : > { %s115_s29 = sshll.u32 %s105_s28, 4  ;;  %p632_p0 = pnand %p374_p13, %p598_p4  ;;  %s628_s29 = int_to_ptr.vmem [resolvable:$true] %s115_s29 }
  0x16   : > { %s102_s2 = scalar_lea.sflag [#allocation3], %s101_s22  ;;  %s428_s3 = scalar_lea.hbm %s626_s27, 128 }
  0x17   : > { %p429_p3 = scmp.ne.s32.totalorder %s626_s27, %s428_s3  ;;  %p430_p5 = pneg %p632_p0 }
  0x18   : > { %s433_s12 = scalar_lea.hbm %s755_s0, 256  ;;  %p434_p4 = scmp.lt.u32.totalorder %s626_s27, %s755_s0 }
  0x19   : > { %p431_p6 = pnand %p430_p5, %p429_p3  ;;  %p435_p10 = scmp.lt.u32.totalorder %s433_s12, %s428_s3 }
  0x1a   : > { %p437_p12 = scmp.lt.u32.totalorder %s428_s3, %s626_s27 }
  0x1b   : > { %p432_p7 = pneg %p431_p6  ;;  %p436_p13 = por %p435_p10, %p434_p4 }
  0x1d   : > { %p438_p1 = por %p437_p12, %p436_p13 }
  0x1f   : > { %p439_p2 = pnand %p438_p1, %p432_p7 }
  0x21   : > { %442 = shalt.err (!%p439_p2)
}
  0x22   : > { %s443_s16 = scalar_lea.vmem %s628_s29, 128  ;;  %s542_s17 = smov [#allocation2]  }
  0x23   : > { %p444_p3 = scmp.ne.s32.totalorder %s628_s29, %s443_s16  ;;  %s448_s22 = sshll.u32 %s542_s17, 4  ;;  %s449_s22 = int_to_ptr.vmem [resolvable:$false] %s448_s22 }
  0x24   : > { %s450_s23 = scalar_lea.vmem %s449_s22, 256  ;;  %p451_p9 = scmp.lt.s32.totalorder %s628_s29, %s449_s22 }
  0x25   : > { %p446_p6 = pnand %p444_p3, %p430_p5  ;;  %p452_p4 = scmp.lt.s32.totalorder %s450_s23, %s443_s16 }
  0x27   : > { %p447_p11 = pneg %p446_p6  ;;  %p453_p10 = por %p452_p4, %p451_p9 }
  0x29   : > { %p454_p12 = pnand %p453_p10, %p447_p11 }
  0x2b   : > { %457 = shalt.err (!%p454_p12)
}
  0x2c   : > { %369 = dma.hbm_to_vmem [thread:$0]  (!%p632_p0), %s626_s27, 128, %s628_s29, %s102_s2  }
  0x2d   : > { %p763_p1 = scmp.lt.s32.totalorder %s540_s11, 3  ;;  %p764_p2 = scmp.ge.s32.totalorder %s540_s11, 1 }
  0x2f   : > { %p121_p5 = pnand %p764_p2, %p763_p1 }
  0x30   : > { %s668_s24 = sand.u32 (!%p121_p5), 1, %s524_s7  }
  0x31   : > { %124 = sbr.rel (%p121_p5) target bundleno = 106 (0x6a), region = 24  ;;  %s350_s25 = sshll.u32 (!%p121_p5), %s668_s24, 3 }
  0x32   : > { %s127_s26 = scalar_lea.sflag (!%p121_p5), [#allocation3], %s668_s24  ;;  %s130_s28 = scalar_lea.vmem (!%p121_p5), [#allocation2], %s350_s25 }
  0x38   : > { %511 = dma.done.wait (%p604_p8), %s127_s26, 128  }
  0x39   : > { %513 = vsyncadd (%p604_p8), %s127_s26, 4294967168  ;;  %s351_s27 = sshll.u32 %s668_s24, 2  ;;  %v153_v0 = vlaneseq  ;;  %v543_v2 = vmov 0.0   ;;  %v544_v3 = vmov -inf   ;;  %vm165_vm1 = vcmask 1043456   ;;  %v160_v4 = vld [vmem:[%s130_s28] sm:$0xff] }
  0x3a   : > { %s681_s29 = scalar_lea.vmem [#allocation5], %s351_s27  ;;  %v163_v5 = vcombine.high %v160_v4, %v160_v4  ;;  %v166_v6 = vsel %vm165_vm1, %v160_v4, 0.0  ;;  %v206_v7 = vsel %vm165_vm1, %v160_v4, -inf  ;;  %v545_v16 = vmov 1966171168   ;;  %s361_s18 = sshll.u32 %s532_s9, 6 }
  0x3b   : > { %vm677_vm0 = vcmp.lt.s32.totalorder %v153_v0, 256  ;;  %v167_v8 = vrot.slane %v166_v6, 4  ;;  %v207_v9 = vrot.slane %v206_v7, 4  ;;  %v184_v17 = vunpack.c.l.s4 %v545_v16  ;;  %s261_s30 = sshll.u32 %s681_s29, 4  ;;  %s703_s4 = scalar_lea.hbm %s756_s1, %s361_s18  ;;  %s705_s30 = int_to_ptr.vmem [resolvable:$true] %s261_s30 }
  0x3c   : > { %157 = vst.msk [vmem:[%s681_s29] ss:$2 sm:$0x3] %vm677_vm0, %v543_v2  ;;  %352 = vst.msk [vmem:[%s681_s29 + $0x1] ss:$2 sm:$0x3] %vm677_vm0, %v544_v3 }
  0x3d   : > { %v173_v10 = vsel %vm165_vm1, %v163_v5, 0.0  ;;  %v213_v11 = vsel %vm165_vm1, %v163_v5, -inf  ;;  %v168_v12 = vadd.f32 %v167_v8, %v166_v6  ;;  %v208_v14 = vmax.f32 %v206_v7, %v207_v9  ;;  %s247_s5 = scalar_lea.sflag [#allocation4], %s668_s24  ;;  %s458_s12 = scalar_lea.vmem %s705_s30, 64 }
  0x3e   : > { %v174_v13 = vrot.slane %v173_v10, 4  ;;  %v214_v15 = vrot.slane %v213_v11, 4  ;;  %v185_v26 = vunpack.c.0.s8 %v184_v17  ;;  %v187_v27 = vshrl.u32 %v153_v0, 7  ;;  %p459_p8 = scmp.ne.s32.totalorder %s705_s30, %s458_s12  ;;  %p767_p9 = scmp.ne.s32.totalorder %s760_s19, 0 }
  0x3f   : > { %v169_v18 = vrot.slane %v168_v12, 2  ;;  %v209_v20 = vrot.slane %v208_v14, 2  ;;  %s546_s9 = smov [#allocation5]  }
  0x40   : > { %v175_v19 = vadd.f32 %v174_v13, %v173_v10  ;;  %v215_v21 = vmax.f32 %v213_v11, %v214_v15  ;;  %v188_v36 = vsub.s32 %v185_v26, %v187_v27  ;;  %p460_p11 = pnand %p459_p8, %p767_p9  ;;  %s462_s13 = sshll.u32 %s546_s9, 4  ;;  %s463_s13 = int_to_ptr.vmem [resolvable:$false] %s462_s13 }
  0x41   : > { %v170_v22 = vadd.f32 %v169_v18, %v168_v12  ;;  %v210_v24 = vmax.f32 %v208_v14, %v209_v20  ;;  %s464_s15 = scalar_lea.vmem %s463_s13, 128  ;;  %p465_p7 = scmp.lt.s32.totalorder %s705_s30, %s463_s13 }
  0x42   : > { %v176_v23 = vrot.slane %v175_v19, 2  ;;  %v216_v25 = vrot.slane %v215_v21, 2  ;;  %p461_p0 = pneg %p460_p11  ;;  %p466_p13 = scmp.lt.s32.totalorder %s464_s15, %s458_s12 }
  0x43   : > { %v171_v28 = vrot.slane %v170_v22, 1  ;;  %v211_v30 = vrot.slane %v210_v24, 1  ;;  %v161_v43 = vld [vmem:[%s681_s29] ss:$2 sm:$0x3] }
  0x44   : > { %v177_v29 = vadd.f32 %v176_v23, %v175_v19  ;;  %v217_v31 = vmax.f32 %v215_v21, %v216_v25  ;;  %v353_v44 = vld [vmem:[%s681_s29 + $0x1] ss:$2 sm:$0x3]  ;;  %p467_p3 = por %p466_p13, %p465_p7 }
  0x45   : > { %v172_v32 = vadd.f32 %v171_v28, %v170_v22  ;;  %v212_v34 = vmax.f32 %v210_v24, %v211_v30 }
  0x46   : > { %v178_v33 = vrot.slane %v177_v29, 1  ;;  %v218_v35 = vrot.slane %v217_v31, 1  ;;  %p468_p6 = pnand %p467_p3, %p461_p0 }
  0x48   : > { %v179_v37 = vadd.f32 %v178_v33, %v177_v29  ;;  %v219_v38 = vmax.f32 %v217_v31, %v218_v35 }
  0x4a   : > { %v182_v39 = vcombine.low %v172_v32, %v179_v37  ;;  %v222_v40 = vcombine.low %v212_v34, %v219_v38 }
  0x4c   : > { %v189_v41 = vrot.slane %v182_v39, %v188_v36  ;;  %v229_v42 = vrot.slane %v222_v40, %v188_v36 }
  0x4e   : > { %v196_v45 = vrot.slane %v189_v41, %v188_v36  ;;  %v236_v46 = vrot.slane %v229_v42, %v188_v36 }
  0x50   : > { %v198_v47 = vadd.f32 %v196_v45, %v161_v43  ;;  %v238_v48 = vmax.f32 %v353_v44, %v236_v46 }
  0x52   : > { %203 = vst.msk [vmem:[%s681_s29] ss:$2 sm:$0x3] %vm677_vm0, %v198_v47  ;;  %354 = vst.msk [vmem:[%s681_s29 + $0x1] ss:$2 sm:$0x3] %vm677_vm0, %v238_v48 }
  0x59   : > { %v243_v49 = vld [vmem:[%s681_s29] ss:$2 sm:$0x3] }
  0x5a   : > { %v244_v50 = vmul.f32 0.25, %v243_v49 }
  0x5c   : > { %245 = vst.msk [vmem:[%s681_s29] ss:$2 sm:$0x3] %vm677_vm0, %v244_v50 }
  0x5d   : > { %471 = shalt.err (!%p468_p6)
}
  0x5e   : > { %s472_s16 = scalar_lea.hbm %s703_s4, 64  ;;  %s476_s23 = scalar_lea.hbm %s756_s1, 128 }
  0x5f   : > { %p473_p4 = scmp.ne.s32.totalorder %s703_s4, %s472_s16  ;;  %p477_p1 = scmp.lt.u32.totalorder %s703_s4, %s756_s1 }
  0x60   : > { %p478_p2 = scmp.lt.u32.totalorder %s476_s23, %s472_s16  ;;  %p480_p8 = scmp.lt.u32.totalorder %s472_s16, %s703_s4 }
  0x61   : > { %p474_p10 = pnand %p473_p4, %p767_p9 }
  0x62   : > { %p479_p5 = por %p478_p2, %p477_p1 }
  0x63   : > { %p475_p12 = pneg %p474_p10 }
  0x64   : > { %p481_p11 = por %p480_p8, %p479_p5 }
  0x66   : > { %p482_p0 = pnand %p481_p11, %p475_p12 }
  0x68   : > { %485 = shalt.err (!%p482_p0)
}
  0x69   : > { %364 = dma.vmem_to_hbm [thread:$0]  (%p767_p9), %s705_s30, 64, %s703_s4, %s247_s5  }
  0x6a PF: > { %s273_s26 = sand.u32 1, %s520_s6   ;;  %p768_p7 = scmp.ne.s32.totalorder %s761_s21, 0 }
  0x6b   : > { %p769_p13 = scmp.ge.s32.totalorder %s540_s11, 2  ;;  %s274_s28 = scalar_lea.sflag [#allocation4], %s273_s26 }
  0x6d   : > { %p371_p3 = pnand %p769_p13, %p768_p7 }
  0x6f   : > { %515 = dma.done.wait (!%p371_p3), %s274_s28, 64  }
  0x70   : > { %517 = vsyncadd (!%p371_p3), %s274_s28, 4294967232  ;;  %s17_s11 = sadd.s32 1, %s540_s11   ;;  %s770_s6 = smov %s524_s7 }
  0x71   : > { %p14_p6 = scmp.ge.s32.totalorder %s17_s11, 4   ;;  %s771_s7 = smov %s528_s8 }
  0x72   : > { %s772_s8 = smov %s613_s20  ;;  %s773_s9 = smov %s536_s10 }
  0x73   : > { %s774_s10 = smov %s776_s14  ;;  %16 = sbr.rel (!%p14_p6) target bundleno = 6 (0x6), region = 79 }
  0x7a   :  { %279 = vsyncpa [#allocation3], 1 }
  0x7b   :  { %281 = vsyncpa [#allocation3 + $0x1], 1 }
  0x7c   :  { %282 = vsyncpa [#allocation4], 1 }
  0x7d   :  { %284 = vsyncpa [#allocation4 + $0x1], 1 }

</bundles_post_ra>
